<compile_context>
chip_gen: v5e
topology: v5e:2x2
jax: 0.10.0
libtpu: 0.0.40
codegen_flags: <defaults>
</compile_context>

<pallas_src>
import jax
import jax.numpy as jnp
from jax.experimental import pallas as pl
from jax.experimental.pallas import tpu as pltpu


# ----------------------------------------------------------------------------
# Kernel
# ----------------------------------------------------------------------------
def value_net_kernel(x_ref, w1_ref, aux_ref, w2_ref, b3_ref, o_ref):
    """x_ref: (S, bt) compute dtype (batch on lanes); w1_ref: (H, S);
    aux_ref: (H, 3) f32 = [b1 | b2 | w3]; w2_ref: (H, H); b3_ref: (1,) SMEM;
    o_ref: (1, bt) f32 lane-dense output row."""
    b1 = aux_ref[:, 0:1]                                   # (H, 1) f32
    b2 = aux_ref[:, 1:2]                                   # (H, 1) f32
    w3 = aux_ref[:, 2:3]                                   # (H, 1) f32

    # Layer 1: (H,S)@(S,bt) on the MXU, f32 accumulation; bias + relu on the VPU.
    h1 = jnp.dot(w1_ref[...], x_ref[...], preferred_element_type=jnp.float32)
    h1 = jnp.maximum(h1 + b1, 0.0)                         # (H, bt) f32

    # Layer 2: cast the activation to the weight dtype (no-op for f32).
    h2 = jnp.dot(w2_ref[...], h1.astype(w2_ref.dtype),
                 preferred_element_type=jnp.float32)
    h2 = jnp.maximum(h2 + b2, 0.0)                         # (H, bt) f32

    # Layer 3 (out_dim == 1): VPU multiply + XLU sublane reduce -> (1, bt) row.
    v = jnp.sum(h2 * w3, axis=0, keepdims=True) + b3_ref[0]
    o_ref[...] = v.astype(o_ref.dtype)


# ----------------------------------------------------------------------------
# Generation-aware configuration
# ----------------------------------------------------------------------------
def _tpu_generation():
    """Best-effort TPU generation guess (5, 6, 7, ...) or None."""
    try:
        kind = jax.devices()[0].device_kind.lower().replace(" ", "")
    except Exception:
        return None
    for g in (7, 6, 5, 4):
        if f"v{g}" in kind or f"tpu{g}" in kind:
            return g
    return None


def _hw_config():
    gen = _tpu_generation()
    try:
        phys_vmem = int(pltpu.get_tpu_info().vmem_capacity_bytes)
    except Exception:
        phys_vmem = (64 << 20) if gen not in (5, 6) else (128 << 20)
    # Always leave headroom below physical VMEM for Mosaic internal scratch.
    vmem_cap = int(min(max(phys_vmem - (12 << 20), 32 << 20), 100 << 20))
    if gen == 7:     # 64 MiB VMEM, 2 TCs, 256-wide MXU, bf16-native
        return dict(gen=7, vmem_cap=vmem_cap, tile_budget=18 << 20,
                    candidates=(512, 256), single_tile_max=255,
                    compute_dtype=jnp.dtype(jnp.bfloat16))
    if gen == 6:     # 128 MiB VMEM, 256-wide MXU, bf16-native
        return dict(gen=6, vmem_cap=vmem_cap, tile_budget=40 << 20,
                    candidates=(1024, 512, 256), single_tile_max=512,
                    compute_dtype=jnp.dtype(jnp.bfloat16))
    if gen == 5:     # 128 MiB VMEM, 128-wide MXU, no bf16 VPU -> keep f32
        return dict(gen=5, vmem_cap=vmem_cap, tile_budget=40 << 20,
                    candidates=(1024, 512, 256, 128), single_tile_max=512,
                    compute_dtype=jnp.dtype(jnp.float32))
    return dict(gen=gen, vmem_cap=vmem_cap, tile_budget=16 << 20,
                candidates=(512, 256, 128), single_tile_max=512,
                compute_dtype=jnp.dtype(jnp.float32))


def _round_up(x, m):
    return (x + m - 1) // m * m


def _auto_batch_tile(B, state_dim, hidden_dim, itemsize, cfg):
    """Single tile for small batches; otherwise a lane-dense (x128) tile giving
    >= 2 grid steps while the per-step VMEM footprint fits the tile budget."""
    if B <= cfg["single_tile_max"]:
        return B
    if cfg["gen"] == 7 and B <= 512:
        # Two tiles so both v7x TensorCores get work (dimension_semantics
        # "parallel" cannot shard a grid of 1); keep tiles lane-dense.
        return _round_up(_round_up(B, 2) // 2, 128)
    weight_bytes = 2 * ((hidden_dim * state_dim + hidden_dim * hidden_dim) * itemsize
                        + hidden_dim * 3 * 4)
    for tile in cfg["candidates"]:
        if B < 2 * tile:            # want >= 2 grid steps (pipelining / megacore)
            continue
        est = (weight_bytes
               + 2 * tile * state_dim * itemsize    # x^T tile (double-buffered)
               + 2 * tile * hidden_dim * 4          # h1/h2 f32 live values
               + 2 * tile * 4)                      # output rows
        if est <= cfg["tile_budget"]:
            return tile
    return cfg["candidates"][-1]


# ----------------------------------------------------------------------------
# Wrapper
# ----------------------------------------------------------------------------
def value_network_forward(state, params, *, batch_tile=None, compute_dtype=None):
    """state: (B, state_dim). params: PyTorch-shaped weights (see init_params).

    Tip: store w1/w2 already in the compute dtype (see prepare_params) so the
    per-call astype is a no-op and the kernel streams bf16 weights directly.
    """
    B, state_dim = state.shape
    hidden_dim, sd = params["w1"].shape
    assert sd == state_dim

    cfg = _hw_config()
    if compute_dtype is None:
        wdt = jnp.dtype(params["w1"].dtype)
        compute_dtype = wdt if wdt.itemsize < 4 else cfg["compute_dtype"]
    compute_dtype = jnp.dtype(compute_dtype)

    if batch_tile is None:
        batch_tile = _auto_batch_tile(B, state_dim, hidden_dim,
                                      compute_dtype.itemsize, cfg)
    batch_tile = int(batch_tile)
    num_tiles = pl.cdiv(B, batch_tile)
    if num_tiles > 1 and batch_tile % 128 != 0:
        raise ValueError("batch_tile must be a multiple of 128 when the batch is tiled")

    # Lane-dense transposed input: batch on lanes -> dense DMA, no in-kernel
    # relayout before the MXU.  Ragged B: the grid clips the last tile (garbage
    # lanes in, dropped columns out); lanes never mix, so results are exact.
    x_t = jnp.asarray(state, compute_dtype).T                            # (S, B)
    w1 = params["w1"].astype(compute_dtype)                              # (H, S)
    w2 = params["w2"].astype(compute_dtype)                              # (H, H)
    aux = jnp.stack([params["b1"].astype(jnp.float32),
                     params["b2"].astype(jnp.float32),
                     params["w3"].astype(jnp.float32).reshape(-1)],
                    axis=1)                                              # (H, 3)
    b3 = params["b3"].astype(jnp.float32).reshape(1)                     # (1,) -> SMEM

    itemsize = compute_dtype.itemsize
    weight_bytes = ((hidden_dim * state_dim + hidden_dim * hidden_dim) * itemsize
                    + hidden_dim * 3 * 4 + 4)
    act_bytes = (2 * batch_tile * state_dim * itemsize
                 + 2 * batch_tile * hidden_dim * 4
                 + 2 * batch_tile * 4)
    vmem_limit = int(min(max(2 * weight_bytes + act_bytes + (8 << 20), 32 << 20),
                         cfg["vmem_cap"]))

    def build(single_buffer_weights):
        def const_spec(shape):
            if single_buffer_weights:
                # Constant blocks (index_map always (0,0)) don't need 2 buffers.
                return pl.BlockSpec(shape, lambda i: (0, 0),
                                    pipeline_mode=pl.Buffered(1))
            return pl.BlockSpec(shape, lambda i: (0, 0))

        return pl.pallas_call(
            value_net_kernel,
            out_shape=jax.ShapeDtypeStruct((1, B), jnp.float32),
            grid_spec=pltpu.PrefetchScalarGridSpec(
                num_scalar_prefetch=0,
                grid=(num_tiles,),
                in_specs=[
                    pl.BlockSpec((state_dim, batch_tile), lambda i: (0, i)),  # x^T tile
                    const_spec((hidden_dim, state_dim)),                      # W1
                    const_spec((hidden_dim, 3)),                              # [b1|b2|w3]
                    const_spec((hidden_dim, hidden_dim)),                     # W2
                    pl.BlockSpec(memory_space=pltpu.MemorySpace.SMEM),        # b3 scalar
                ],
                out_specs=pl.BlockSpec((1, batch_tile), lambda i: (0, i)),    # lane-dense
            ),
            compiler_params=pltpu.CompilerParams(
                dimension_semantics=("parallel",),
                vmem_limit_bytes=vmem_limit,
            ),
        )

    try:
        out_row = build(True)(x_t, w1, aux, w2, b3)
    except Exception:
        # Fallback if this runtime rejects single-buffered constant blocks.
        out_row = build(False)(x_t, w1, aux, w2, b3)

    return out_row.reshape(B, 1)


def prepare_params(params, compute_dtype=None):
    """Pre-cast the matmul weights once (store & reuse) so repeated forwards do
    not re-read/re-cast W1/W2 from HBM on every call."""
    if compute_dtype is None:
        compute_dtype = _hw_config()["compute_dtype"]
    p = dict(params)
    p["w1"] = params["w1"].astype(compute_dtype)
    p["w2"] = params["w2"].astype(compute_dtype)
    return p


# ----------------------------------------------------------------------------
# Parameters / reference
# ----------------------------------------------------------------------------
def init_params(key, state_dim, hidden_dim, init_w=0.003):
    """PyTorch-shaped parameters. layer1/layer2: default nn.Linear init
    (uniform +/- 1/sqrt(fan_in)); layer3: uniform +/- init_w."""
    k1, k2, k3, k4, k5, k6 = jax.random.split(key, 6)
    bnd1 = 1.0 / float(state_dim) ** 0.5
    bnd2 = 1.0 / float(hidden_dim) ** 0.5
    return {
        "w1": jax.random.uniform(k1, (hidden_dim, state_dim), jnp.float32, -bnd1, bnd1),
        "b1": jax.random.uniform(k2, (hidden_dim,), jnp.float32, -bnd1, bnd1),
        "w2": jax.random.uniform(k3, (hidden_dim, hidden_dim), jnp.float32, -bnd2, bnd2),
        "b2": jax.random.uniform(k4, (hidden_dim,), jnp.float32, -bnd2, bnd2),
        "w3": jax.random.uniform(k5, (1, hidden_dim), jnp.float32, -init_w, init_w),
        "b3": jax.random.uniform(k6, (1,), jnp.float32, -init_w, init_w),
    }


def value_network_ref(state, params):
    """Pure-JAX reference (mirrors the PyTorch forward exactly)."""
    x = jnp.maximum(state @ params["w1"].T + params["b1"], 0.0)
    x = jnp.maximum(x @ params["w2"].T + params["b2"], 0.0)
    return x @ params["w3"].T + params["b3"]


if __name__ == "__main__":
    key = jax.random.PRNGKey(0)
    kp, kx1, kx2 = jax.random.split(key, 3)

    batch, state_dim, hidden_dim = 8, 16, 32
    params = init_params(kp, state_dim, hidden_dim)
    state = jax.random.normal(kx1, (batch, state_dim), jnp.float32)
    ref = value_network_ref(state, params)

    # 1) Generation default (bf16 matmul operands on v6e/v7x, f32 elsewhere).
    out = jax.block_until_ready(value_network_forward(state, params))
    assert out.shape == (batch, 1), out.shape
    assert jnp.allclose(out, ref, atol=5e-3, rtol=5e-2), (out, ref)

    # 2) Explicit f32 path: tight parity with the PyTorch/JAX reference.
    out_f32 = jax.block_until_ready(
        value_network_forward(state, params, compute_dtype=jnp.float32))
    assert jnp.allclose(out_f32, ref, atol=1e-5, rtol=1e-5), (out_f32, ref)

    # 3) Explicit bf16 matmul operands (f32 accumulation / bias / relu / layer 3).
    out_bf16 = jax.block_until_ready(
        value_network_forward(state, params, compute_dtype=jnp.bfloat16))
    assert jnp.allclose(out_bf16, ref, atol=5e-3, rtol=5e-2), (out_bf16, ref)

    # 4) Multi-tile grid + ragged batch (last tile clipped by the grid, no pad).
    big_batch = 1000
    state_big = jax.random.normal(kx2, (big_batch, state_dim), jnp.float32)
    ref_big = value_network_ref(state_big, params)
    out_big_f32 = jax.block_until_ready(
        value_network_forward(state_big, params, compute_dtype=jnp.float32))
    assert out_big_f32.shape == (big_batch, 1)
    assert jnp.allclose(out_big_f32, ref_big, atol=1e-5, rtol=1e-5)
    out_big = jax.block_until_ready(value_network_forward(state_big, params))
    assert out_big.shape == (big_batch, 1)
    assert jnp.allclose(out_big, ref_big, atol=1e-2, rtol=5e-2)

    print("KERNEL_OK")
</pallas_src>

<mosaic_0001>
module attributes {stable_mosaic.version = 11 : i64} {
  func.func @value_net_kernel(%arg0: i32, %arg1: memref<16x8xf32, #tpu.memory_space<vmem>>, %arg2: memref<32x16xf32, #tpu.memory_space<vmem>>, %arg3: memref<32x3xf32, #tpu.memory_space<vmem>>, %arg4: memref<32x32xf32, #tpu.memory_space<vmem>>, %arg5: memref<1xf32, #tpu.memory_space<smem>>, %arg6: memref<1x8xf32, #tpu.memory_space<vmem>>) attributes {dimension_semantics = [#tpu.dimension_semantics<parallel>], iteration_bounds = array<i64: 1>, scalar_prefetch = 0 : i64, scratch_operands = 0 : i64, tpu.core_type = #tpu.core_type<tc>, window_params = [{transform_indices = @transform_0, window_bounds = array<i64: 16, 8>}, {pipeline_mode = #tpu.pipeline_mode<synchronous>, transform_indices = @transform_1, window_bounds = array<i64: 32, 16>}, {pipeline_mode = #tpu.pipeline_mode<synchronous>, transform_indices = @transform_2, window_bounds = array<i64: 32, 3>}, {pipeline_mode = #tpu.pipeline_mode<synchronous>, transform_indices = @transform_3, window_bounds = array<i64: 32, 32>}, {transform_indices = @transform_4, window_bounds = array<i64: 1>}, {transform_indices = @transform_5, window_bounds = array<i64: 1, 8>}]} {
    %c0 = arith.constant 0 : index
    %c0_0 = arith.constant 0 : index
    %0 = vector.load %arg3[%c0, %c0_0] : memref<32x3xf32, #tpu.memory_space<vmem>>, vector<32x1xf32>
    %c0_1 = arith.constant 0 : index
    %c1 = arith.constant 1 : index
    %1 = vector.load %arg3[%c0_1, %c1] : memref<32x3xf32, #tpu.memory_space<vmem>>, vector<32x1xf32>
    %c0_2 = arith.constant 0 : index
    %c2 = arith.constant 2 : index
    %2 = vector.load %arg3[%c0_2, %c2] : memref<32x3xf32, #tpu.memory_space<vmem>>, vector<32x1xf32>
    %c0_3 = arith.constant 0 : index
    %c0_4 = arith.constant 0 : index
    %3 = vector.load %arg2[%c0_3, %c0_4] : memref<32x16xf32, #tpu.memory_space<vmem>>, vector<32x16xf32>
    %c0_5 = arith.constant 0 : index
    %c0_6 = arith.constant 0 : index
    %4 = vector.load %arg1[%c0_5, %c0_6] : memref<16x8xf32, #tpu.memory_space<vmem>>, vector<16x8xf32>
    %cst = arith.constant dense<0.000000e+00> : vector<32x8xf32>
    %5 = tpu.matmul %3, %4, %cst {dimension_numbers = #tpu.dot_dimension_numbers<[1], [0], [0], [1], [0, 0, 1, 1], [], []>} : vector<32x16xf32>, vector<16x8xf32>, vector<32x8xf32> -> vector<32x8xf32>
    %6 = vector.broadcast %0 : vector<32x1xf32> to vector<32x8xf32>
    %7 = arith.addf %5, %6 : vector<32x8xf32>
    %cst_7 = arith.constant 0.000000e+00 : f32
    %8 = vector.broadcast %cst_7 : f32 to vector<32x8xf32>
    %9 = arith.maximumf %7, %8 : vector<32x8xf32>
    %c0_8 = arith.constant 0 : index
    %c0_9 = arith.constant 0 : index
    %10 = vector.load %arg4[%c0_8, %c0_9] : memref<32x32xf32, #tpu.memory_space<vmem>>, vector<32x32xf32>
    %cst_10 = arith.constant dense<0.000000e+00> : vector<32x8xf32>
    %11 = tpu.matmul %10, %9, %cst_10 {dimension_numbers = #tpu.dot_dimension_numbers<[1], [0], [0], [1], [0, 0, 1, 1], [], []>} : vector<32x32xf32>, vector<32x8xf32>, vector<32x8xf32> -> vector<32x8xf32>
    %12 = vector.broadcast %1 : vector<32x1xf32> to vector<32x8xf32>
    %13 = arith.addf %11, %12 : vector<32x8xf32>
    %cst_11 = arith.constant 0.000000e+00 : f32
    %14 = vector.broadcast %cst_11 : f32 to vector<32x8xf32>
    %15 = arith.maximumf %13, %14 : vector<32x8xf32>
    %16 = vector.broadcast %2 : vector<32x1xf32> to vector<32x8xf32>
    %17 = arith.mulf %15, %16 : vector<32x8xf32>
    %cst_12 = arith.constant dense<0.000000e+00> : vector<8xf32>
    %18 = vector.multi_reduction <add>, %17, %cst_12 [0] : vector<32x8xf32> to vector<8xf32>
    %19 = vector.shape_cast %18 : vector<8xf32> to vector<1x8xf32>
    %c0_13 = arith.constant 0 : index
    %20 = memref.load %arg5[%c0_13] : memref<1xf32, #tpu.memory_space<smem>>
    %21 = vector.broadcast %20 : f32 to vector<1x8xf32>
    %22 = arith.addf %19, %21 : vector<1x8xf32>
    %c0_14 = arith.constant 0 : index
    %c0_15 = arith.constant 0 : index
    %23 = vector.load %arg6[%c0_14, %c0_15] : memref<1x8xf32, #tpu.memory_space<vmem>>, vector<1x8xf32>
    tpu.vector_store %arg6[%c0_14, %c0_15], %22 {strides = array<i32>} : memref<1x8xf32, #tpu.memory_space<vmem>>, vector<1x8xf32>,
    return
  }
  func.func @transform_0(%arg0: i32) -> (i32, i32) {
    %c0_i32 = arith.constant 0 : i32
    %c0_i32_0 = arith.constant 0 : i32
    return %c0_i32, %arg0 : i32, i32
  }
  func.func @transform_1(%arg0: i32) -> (i32, i32) {
    %c0_i32 = arith.constant 0 : i32
    %c0_i32_0 = arith.constant 0 : i32
    %c0_i32_1 = arith.constant 0 : i32
    return %c0_i32, %c0_i32_0 : i32, i32
  }
  func.func @transform_2(%arg0: i32) -> (i32, i32) {
    %c0_i32 = arith.constant 0 : i32
    %c0_i32_0 = arith.constant 0 : i32
    %c0_i32_1 = arith.constant 0 : i32
    return %c0_i32, %c0_i32_0 : i32, i32
  }
  func.func @transform_3(%arg0: i32) -> (i32, i32) {
    %c0_i32 = arith.constant 0 : i32
    %c0_i32_0 = arith.constant 0 : i32
    %c0_i32_1 = arith.constant 0 : i32
    return %c0_i32, %c0_i32_0 : i32, i32
  }
  func.func @transform_4(%arg0: i32) -> i32 {
    %c0_i32 = arith.constant 0 : i32
    %c0_i32_0 = arith.constant 0 : i32
    return %c0_i32 : i32
  }
  func.func @transform_5(%arg0: i32) -> (i32, i32) {
    %c0_i32 = arith.constant 0 : i32
    %c0_i32_0 = arith.constant 0 : i32
    return %c0_i32, %arg0 : i32, i32
  }
}

module attributes {stable_mosaic.version = 11 : i64} {
  func.func @value_net_kernel(%arg0: i32, %arg1: memref<16x8xf32, #tpu.memory_space<vmem>>, %arg2: memref<32x16xf32, #tpu.memory_space<vmem>>, %arg3: memref<32x3xf32, #tpu.memory_space<vmem>>, %arg4: memref<32x32xf32, #tpu.memory_space<vmem>>, %arg5: memref<1xf32, #tpu.memory_space<smem>>, %arg6: memref<1x8xf32, #tpu.memory_space<vmem>>) attributes {dimension_semantics = [#tpu.dimension_semantics<parallel>], iteration_bounds = array<i64: 1>, scalar_prefetch = 0 : i64, scratch_operands = 0 : i64, tpu.core_type = #tpu.core_type<tc>, window_params = [{transform_indices = @transform_0, window_bounds = array<i64: 16, 8>}, {pipeline_mode = #tpu.pipeline_mode<synchronous>, transform_indices = @transform_1, window_bounds = array<i64: 32, 16>}, {pipeline_mode = #tpu.pipeline_mode<synchronous>, transform_indices = @transform_2, window_bounds = array<i64: 32, 3>}, {pipeline_mode = #tpu.pipeline_mode<synchronous>, transform_indices = @transform_3, window_bounds = array<i64: 32, 32>}, {transform_indices = @transform_4, window_bounds = array<i64: 1>}, {transform_indices = @transform_5, window_bounds = array<i64: 1, 8>}]} {
    %c0 = arith.constant 0 : index
    %c0_0 = arith.constant 0 : index
    %0 = vector.load %arg3[%c0, %c0_0] : memref<32x3xf32, #tpu.memory_space<vmem>>, vector<32x1xf32>
    %c0_1 = arith.constant 0 : index
    %c1 = arith.constant 1 : index
    %1 = vector.load %arg3[%c0_1, %c1] : memref<32x3xf32, #tpu.memory_space<vmem>>, vector<32x1xf32>
    %c0_2 = arith.constant 0 : index
    %c2 = arith.constant 2 : index
    %2 = vector.load %arg3[%c0_2, %c2] : memref<32x3xf32, #tpu.memory_space<vmem>>, vector<32x1xf32>
    %c0_3 = arith.constant 0 : index
    %c0_4 = arith.constant 0 : index
    %3 = vector.load %arg2[%c0_3, %c0_4] : memref<32x16xf32, #tpu.memory_space<vmem>>, vector<32x16xf32>
    %c0_5 = arith.constant 0 : index
    %c0_6 = arith.constant 0 : index
    %4 = vector.load %arg1[%c0_5, %c0_6] : memref<16x8xf32, #tpu.memory_space<vmem>>, vector<16x8xf32>
    %cst = arith.constant dense<0.000000e+00> : vector<32x8xf32>
    %5 = tpu.matmul %3, %4, %cst {dimension_numbers = #tpu.dot_dimension_numbers<[1], [0], [0], [1], [0, 0, 1, 1], [], []>} : vector<32x16xf32>, vector<16x8xf32>, vector<32x8xf32> -> vector<32x8xf32>
    %6 = vector.broadcast %0 : vector<32x1xf32> to vector<32x8xf32>
    %7 = arith.addf %5, %6 : vector<32x8xf32>
    %cst_7 = arith.constant 0.000000e+00 : f32
    %8 = vector.broadcast %cst_7 : f32 to vector<32x8xf32>
    %9 = arith.maximumf %7, %8 : vector<32x8xf32>
    %c0_8 = arith.constant 0 : index
    %c0_9 = arith.constant 0 : index
    %10 = vector.load %arg4[%c0_8, %c0_9] : memref<32x32xf32, #tpu.memory_space<vmem>>, vector<32x32xf32>
    %cst_10 = arith.constant dense<0.000000e+00> : vector<32x8xf32>
    %11 = tpu.matmul %10, %9, %cst_10 {dimension_numbers = #tpu.dot_dimension_numbers<[1], [0], [0], [1], [0, 0, 1, 1], [], []>} : vector<32x32xf32>, vector<32x8xf32>, vector<32x8xf32> -> vector<32x8xf32>
    %12 = vector.broadcast %1 : vector<32x1xf32> to vector<32x8xf32>
    %13 = arith.addf %11, %12 : vector<32x8xf32>
    %cst_11 = arith.constant 0.000000e+00 : f32
    %14 = vector.broadcast %cst_11 : f32 to vector<32x8xf32>
    %15 = arith.maximumf %13, %14 : vector<32x8xf32>
    %16 = vector.broadcast %2 : vector<32x1xf32> to vector<32x8xf32>
    %17 = arith.mulf %15, %16 : vector<32x8xf32>
    %cst_12 = arith.constant dense<0.000000e+00> : vector<8xf32>
    %18 = vector.multi_reduction <add>, %17, %cst_12 [0] : vector<32x8xf32> to vector<8xf32>
    %19 = vector.shape_cast %18 : vector<8xf32> to vector<1x8xf32>
    %c0_13 = arith.constant 0 : index
    %20 = memref.load %arg5[%c0_13] : memref<1xf32, #tpu.memory_space<smem>>
    %21 = vector.broadcast %20 : f32 to vector<1x8xf32>
    %22 = arith.addf %19, %21 : vector<1x8xf32>
    %c0_14 = arith.constant 0 : index
    %c0_15 = arith.constant 0 : index
    %23 = vector.load %arg6[%c0_14, %c0_15] : memref<1x8xf32, #tpu.memory_space<vmem>>, vector<1x8xf32>
    tpu.vector_store %arg6[%c0_14, %c0_15], %22 {strides = array<i32>} : memref<1x8xf32, #tpu.memory_space<vmem>>, vector<1x8xf32>,
    return
  }
  func.func @transform_0(%arg0: i32) -> (i32, i32) {
    %c0_i32 = arith.constant 0 : i32
    %c0_i32_0 = arith.constant 0 : i32
    return %c0_i32, %arg0 : i32, i32
  }
  func.func @transform_1(%arg0: i32) -> (i32, i32) {
    %c0_i32 = arith.constant 0 : i32
    %c0_i32_0 = arith.constant 0 : i32
    %c0_i32_1 = arith.constant 0 : i32
    return %c0_i32, %c0_i32_0 : i32, i32
  }
  func.func @transform_2(%arg0: i32) -> (i32, i32) {
    %c0_i32 = arith.constant 0 : i32
    %c0_i32_0 = arith.constant 0 : i32
    %c0_i32_1 = arith.constant 0 : i32
    return %c0_i32, %c0_i32_0 : i32, i32
  }
  func.func @transform_3(%arg0: i32) -> (i32, i32) {
    %c0_i32 = arith.constant 0 : i32
    %c0_i32_0 = arith.constant 0 : i32
    %c0_i32_1 = arith.constant 0 : i32
    return %c0_i32, %c0_i32_0 : i32, i32
  }
  func.func @transform_4(%arg0: i32) -> i32 {
    %c0_i32 = arith.constant 0 : i32
    %c0_i32_0 = arith.constant 0 : i32
    return %c0_i32 : i32
  }
  func.func @transform_5(%arg0: i32) -> (i32, i32) {
    %c0_i32 = arith.constant 0 : i32
    %c0_i32_0 = arith.constant 0 : i32
    return %c0_i32, %arg0 : i32, i32
  }
}

</mosaic_0001>

<bundles_post_ra>
// kernel: tpu_custom_call.1
= control target key start
LH: loop header
LB: loop body
LE: loop exit
PB: predicated region body
PF: predicated region fallthrough
CT: control target
= control target key end

     0   :  { %vm52_vm0 = vcmask 130048   ;;  %v271_v3 = vmov 0   ;;  %s357_s0 = inlined_call_operand.vmem [shape: f32[16,8], index: 0, kind: input, shape index: {}]   ;;  %s358_s1 = inlined_call_operand.vmem [shape: f32[32,16], index: 1, kind: input, shape index: {}]   ;;  %s359_s2 = inlined_call_operand.vmem [shape: f32[32,3], index: 2, kind: input, shape index: {}]   ;;  %s360_s3 = inlined_call_operand.vmem [shape: f32[32,32], index: 3, kind: input, shape index: {}]   ;;  %s361_s4 = inlined_call_operand.<no memory space> [shape: f32[1], index: 4, kind: input, shape index: {}]   ;;  %s362_s5 = inlined_call_operand.hbm [shape: f32[1,8], index: 5, kind: output, shape index: {}]  }
   0x1   :  { %v31_v0 = vld [vmem:[%s357_s0 + $0x8] sm:$0xff]  ;;  %v30_v1 = vld [vmem:[%s357_s0] sm:$0xff]  ;;  %238 = vset.pattern.permute.xlu1 %v271_v3  ;;  %v25_v4 = vld [vmem:[%s359_s2 + $0x18] sm:$0xff]  ;;  %237 = vset.pattern.permute.xlu0 %v271_v3 }
   0x2   :  { %227 = vmatpush.msra.mxu3 %v31_v0  ;;  %v27_v2 = vld [vmem:[%s358_s1 + $0x8] sm:$0xff]  ;;  %79 = vmatpush.msra.mxu0 %v31_v0  ;;  %v26_v6 = vld [vmem:[%s358_s1] sm:$0xff] }
   0x3   :  { %v23_v5 = vld [vmem:[%s359_s2 + $0x8] sm:$0xff]  ;;  %49 = vperm.xlu0 %237, %v25_v4  }
   0x4   :  { %228 = vmatpush.msra.mxu3 %v30_v1 }
   0x5   :  { %11 = vsyncpa [#allocation4], 0  ;;  %220 = vmatmul.msk.f32.vlgmr.msra.gmra.mxu3 %vm52_vm0, %v27_v2  ;;  %39 = vperm.xlu1 %238, %v23_v5   ;;  %v24_v7 = vld [vmem:[%s359_s2 + $0x10] sm:$0xff]  ;;  %v22_v9 = vld [vmem:[%s359_s2] sm:$0xff]  ;;  %v272_v13 = vmov 1   ;;  %v273_v17 = vmov 2  }
   0x6   :  { %80 = vmatpush.msra.mxu0 %v30_v1  ;;  %v28_v8 = vld [vmem:[%s358_s1 + $0x10] sm:$0xff]  ;;  %v29_v10 = vld [vmem:[%s358_s1 + $0x18] sm:$0xff]  ;;  %239 = vset.pattern.permute.xlu2 %v272_v13  ;;  %v98_v29 = vld [vmem:[%s360_s3] sm:$0xff]  ;;  %vm118_vm1 = vcmask 261120   ;;  %vm184_vm2 = vcmask 64512   ;;  %s274_s19 = smov [#allocation3]  }
   0x7   :  { %219 = vmatmul.msk.f32.vlgmr.msra.gmra.mxu0 %vm52_vm0, %v26_v6  ;;  %103 = vperm.xlu2 %239, %v22_v9   ;;  %v100_v30 = vld [vmem:[%s360_s3 + $0x10] sm:$0xff]  ;;  %v99_v31 = vld [vmem:[%s360_s3 + $0x8] sm:$0xff]  ;;  %v101_v32 = vld [vmem:[%s360_s3 + $0x18] sm:$0xff]  ;;  %s208_s20 = sshll.u32 %s274_s19, 4  ;;  %s210_s23 = sshll.u32 %s362_s5, 4  ;;  %vm201_vm3 = vcmask 57344   ;;  %s209_s20 = int_to_ptr.vmem [resolvable:$true] %s208_s20  ;;  %s211_s23 = int_to_ptr.hbm [resolvable:$true] %s210_s23 }
   0xb   :  { %44 = vperm.xlu0 %237, %v24_v7  }
   0xd   :  { %221 = vmatmul.msk.f32.gmra.mxu3 %vm52_vm0, %v28_v8  ;;  %34 = vperm.xlu1 %238, %v22_v9  }
   0xf   :  { %107 = vperm.xlu2 %239, %v23_v5  }
  0x13   :  { %240 = vset.pattern.permute.xlu0 %v272_v13 }
  0x14   :  { %111 = vperm.xlu0 %240, %v24_v7  }
  0x15   :  { %222 = vmatmul.msk.f32.gmra.mxu3 %vm52_vm0, %v29_v10  ;;  %241 = vset.pattern.permute.xlu1 %v272_v13 }
  0x16   :  { %115 = vperm.xlu1 %241, %v25_v4  }
  0x17   :  { %242 = vset.pattern.permute.xlu2 %v273_v17 }
  0x18   :  { %165 = vperm.xlu2 %242, %v22_v9  }
  0x1c   :  { %244 = vset.pattern.permute.xlu0 %v273_v17 }
  0x1d   :  { %177 = vperm.xlu0 %244, %v25_v4  }
  0x1e   :  { %243 = vset.pattern.permute.xlu1 %v273_v17 }
  0x1f   :  { %169 = vperm.xlu1 %243, %v23_v5   ;;  %v199_v5 = vstv %s361_s4 }
  0x20   :  { %173 = vperm.xlu2 %242, %v24_v7  }
  0x61   :  { %v104_v33 = vpop.permute.xlu2 %103 }
  0x69   :  { %v108_v34 = vpop.permute.xlu2 %107 }
  0x72   :  { %v166_v38 = vpop.permute.xlu2 %165 }
  0x75   :  { %v50_v12 = vpop.permute.xlu0 %49 }
  0x77   :  { %v40_v15 = vpop.permute.xlu1 %39 }
  0x7a   :  { %v174_v50 = vpop.permute.xlu2 %173 }
  0x7d   :  { %v45_v16 = vpop.permute.xlu0 %44 }
  0x7f   :  { %v35_v22 = vpop.permute.xlu1 %34 }
  0x84   :  { %v82_v21 = vpop.f32.mrf.mxu0 }
  0x85   :  { %v83_v26 = vadd.f32 %v82_v21, %v35_v22 }
  0x86   :  { %v112_v39 = vpop.permute.xlu0 %111 }
  0x87   :  { %v94_v28 = vmax.f32 %v83_v26, 0.0 }
  0x88   :  { %v85_v11 = vpop.f32.mrf.mxu3  ;;  %v116_v36 = vpop.permute.xlu1 %115 }
  0x89   :  { %v86_v23 = vadd.f32 %v85_v11, %v40_v15 }
  0x8b   :  { %v95_v27 = vmax.f32 %v86_v23, 0.0 }
  0x8f   :  { %v178_v57 = vpop.permute.xlu0 %177 }
  0x90   :  { %v88_v14 = vpop.f32.mrf.mxu3 }
  0x91   :  { %v89_v19 = vadd.f32 %v88_v14, %v45_v16  ;;  %v170_v45 = vpop.permute.xlu1 %169 }
  0x93   :  { %v96_v25 = vmax.f32 %v89_v19, 0.0 }
  0x98   :  { %v91_v18 = vpop.f32.mrf.mxu3 }
  0x99   :  { %v92_v20 = vadd.f32 %v91_v18, %v50_v12 }
  0x9b   :  { %v97_v24 = vmax.f32 %v92_v20, 0.0 }
  0x9d   :  { %143 = vmatpush.msra.mxu1 %v97_v24  ;;  %229 = vmatpush.msra.mxu2 %v97_v24 }
  0x9f   :  { %144 = vmatpush.msra.mxu1 %v96_v25  ;;  %230 = vmatpush.msra.mxu2 %v96_v25 }
  0xa1   :  { %145 = vmatpush.msra.mxu1 %v95_v27  ;;  %231 = vmatpush.msra.mxu2 %v95_v27 }
  0xa3   :  { %146 = vmatpush.msra.mxu1 %v94_v28  ;;  %232 = vmatpush.msra.mxu2 %v94_v28 }
  0xa4   :  { %223 = vmatmul.msk.f32.vlgmr.msra.gmra.mxu1 %vm118_vm1, %v98_v29  ;;  %225 = vmatmul.msk.f32.vlgmr.msra.gmra.mxu2 %vm118_vm1, %v100_v30 }
  0xac   :  { %224 = vmatmul.msk.f32.gmra.mxu1 %vm118_vm1, %v99_v31  ;;  %226 = vmatmul.msk.f32.gmra.mxu2 %vm118_vm1, %v101_v32 }
 0x121   :  { %v148_v35 = vpop.f32.mrf.mxu1 }
 0x122   :  { %v149_v37 = vadd.f32 %v148_v35, %v104_v33 }
 0x124   :  { %v160_v41 = vmax.f32 %v149_v37, 0.0 }
 0x126   :  { %v180_v46 = vmul.f32 %v166_v38, %v160_v41 }
 0x127   :  { %v154_v40 = vpop.f32.mrf.mxu2 }
 0x128   :  { %v155_v42 = vadd.f32 %v154_v40, %v112_v39  ;;  %v185_v53 = vsel %vm184_vm2, %v180_v46, 0.0 }
 0x129   :  { %v151_v43 = vpop.f32.mrf.mxu1 }
 0x12a   :  { %v152_v44 = vadd.f32 %v151_v43, %v108_v34  ;;  %v162_v47 = vmax.f32 %v155_v42, 0.0 }
 0x12c   :  { %v161_v48 = vmax.f32 %v152_v44, 0.0  ;;  %v182_v52 = vmul.f32 %v174_v50, %v162_v47 }
 0x12e   :  { %v181_v49 = vmul.f32 %v170_v45, %v161_v48  ;;  %v188_v59 = vsel %vm184_vm2, %v182_v52, 0.0 }
 0x12f   :  { %v157_v51 = vpop.f32.mrf.mxu2 }
 0x130   :  { %v186_v54 = vsel %vm184_vm2, %v181_v49, 0.0  ;;  %v158_v55 = vadd.f32 %v157_v51, %v116_v36 }
 0x131   :  { %v187_v56 = vadd.f32 %v186_v54, %v185_v53 }
 0x132   :  { %v163_v58 = vmax.f32 %v158_v55, 0.0 }
 0x133   :  { %v189_v61 = vadd.f32 %v188_v59, %v187_v56 }
 0x134   :  { %v183_v60 = vmul.f32 %v178_v57, %v163_v58 }
 0x136   :  { %v190_v62 = vsel %vm184_vm2, %v183_v60, 0.0 }
 0x137   :  { %v191_v63 = vadd.f32 %v190_v62, %v189_v61 }
 0x139   :  { %v192_v0 = vrot.slane %v191_v63, 4 }
 0x13b   :  { %v193_v1 = vadd.f32 %v192_v0, %v191_v63 }
 0x13d   :  { %v194_v2 = vrot.slane %v193_v1, 2 }
 0x13f   :  { %v195_v3 = vadd.f32 %v194_v2, %v193_v1 }
 0x141   :  { %v196_v4 = vrot.slane %v195_v3, 1 }
 0x143   :  { %v197_v6 = vadd.f32 %v196_v4, %v195_v3 }
 0x145   :  { %v200_v7 = vadd.f32 %v199_v5, %v197_v6 }
 0x147   :  { %202 = vst.msk [vmem:[#allocation3] sm:$0x1] %vm201_vm3, %v200_v7 }
 0x148   :  { %213 = dma.vmem_to_hbm [thread:$0]  %s209_s20, 16, %s211_s23, [#allocation4]  }
 0x149   :  { %269 = dma.done.wait [#allocation4], 16  }
 0x14a   :  { %270 = vsyncadd [#allocation4], 4294967280 }
 0x14b   :  { %218 = vsyncpa [#allocation4], 1 }

// kernel: tpu_custom_call.1
= control target key start
LH: loop header
LB: loop body
LE: loop exit
PB: predicated region body
PF: predicated region fallthrough
CT: control target
= control target key end

     0   :  { %vm52_vm0 = vcmask 130048   ;;  %v271_v3 = vmov 0   ;;  %s357_s0 = inlined_call_operand.vmem [shape: f32[16,8], index: 0, kind: input, shape index: {}]   ;;  %s358_s1 = inlined_call_operand.vmem [shape: f32[32,16], index: 1, kind: input, shape index: {}]   ;;  %s359_s2 = inlined_call_operand.vmem [shape: f32[32,3], index: 2, kind: input, shape index: {}]   ;;  %s360_s3 = inlined_call_operand.vmem [shape: f32[32,32], index: 3, kind: input, shape index: {}]   ;;  %s361_s4 = inlined_call_operand.<no memory space> [shape: f32[1], index: 4, kind: input, shape index: {}]   ;;  %s362_s5 = inlined_call_operand.hbm [shape: f32[1,8], index: 5, kind: output, shape index: {}]  }
   0x1   :  { %v31_v0 = vld [vmem:[%s357_s0 + $0x8] sm:$0xff]  ;;  %v30_v1 = vld [vmem:[%s357_s0] sm:$0xff]  ;;  %238 = vset.pattern.permute.xlu1 %v271_v3  ;;  %v25_v4 = vld [vmem:[%s359_s2 + $0x18] sm:$0xff]  ;;  %237 = vset.pattern.permute.xlu0 %v271_v3 }
   0x2   :  { %227 = vmatpush.msra.mxu3 %v31_v0  ;;  %v27_v2 = vld [vmem:[%s358_s1 + $0x8] sm:$0xff]  ;;  %79 = vmatpush.msra.mxu0 %v31_v0  ;;  %v26_v6 = vld [vmem:[%s358_s1] sm:$0xff] }
   0x3   :  { %v23_v5 = vld [vmem:[%s359_s2 + $0x8] sm:$0xff]  ;;  %49 = vperm.xlu0 %237, %v25_v4  }
   0x4   :  { %228 = vmatpush.msra.mxu3 %v30_v1 }
   0x5   :  { %11 = vsyncpa [#allocation4], 0  ;;  %220 = vmatmul.msk.f32.vlgmr.msra.gmra.mxu3 %vm52_vm0, %v27_v2  ;;  %39 = vperm.xlu1 %238, %v23_v5   ;;  %v24_v7 = vld [vmem:[%s359_s2 + $0x10] sm:$0xff]  ;;  %v22_v9 = vld [vmem:[%s359_s2] sm:$0xff]  ;;  %v272_v13 = vmov 1   ;;  %v273_v17 = vmov 2  }
   0x6   :  { %80 = vmatpush.msra.mxu0 %v30_v1  ;;  %v28_v8 = vld [vmem:[%s358_s1 + $0x10] sm:$0xff]  ;;  %v29_v10 = vld [vmem:[%s358_s1 + $0x18] sm:$0xff]  ;;  %239 = vset.pattern.permute.xlu2 %v272_v13  ;;  %v98_v29 = vld [vmem:[%s360_s3] sm:$0xff]  ;;  %vm118_vm1 = vcmask 261120   ;;  %vm184_vm2 = vcmask 64512   ;;  %s274_s19 = smov [#allocation3]  }
   0x7   :  { %219 = vmatmul.msk.f32.vlgmr.msra.gmra.mxu0 %vm52_vm0, %v26_v6  ;;  %103 = vperm.xlu2 %239, %v22_v9   ;;  %v100_v30 = vld [vmem:[%s360_s3 + $0x10] sm:$0xff]  ;;  %v99_v31 = vld [vmem:[%s360_s3 + $0x8] sm:$0xff]  ;;  %v101_v32 = vld [vmem:[%s360_s3 + $0x18] sm:$0xff]  ;;  %s208_s20 = sshll.u32 %s274_s19, 4  ;;  %s210_s23 = sshll.u32 %s362_s5, 4  ;;  %vm201_vm3 = vcmask 57344   ;;  %s209_s20 = int_to_ptr.vmem [resolvable:$true] %s208_s20  ;;  %s211_s23 = int_to_ptr.hbm [resolvable:$true] %s210_s23 }
   0xb   :  { %44 = vperm.xlu0 %237, %v24_v7  }
   0xd   :  { %221 = vmatmul.msk.f32.gmra.mxu3 %vm52_vm0, %v28_v8  ;;  %34 = vperm.xlu1 %238, %v22_v9  }
   0xf   :  { %107 = vperm.xlu2 %239, %v23_v5  }
  0x13   :  { %240 = vset.pattern.permute.xlu0 %v272_v13 }
  0x14   :  { %111 = vperm.xlu0 %240, %v24_v7  }
  0x15   :  { %222 = vmatmul.msk.f32.gmra.mxu3 %vm52_vm0, %v29_v10  ;;  %241 = vset.pattern.permute.xlu1 %v272_v13 }
  0x16   :  { %115 = vperm.xlu1 %241, %v25_v4  }
  0x17   :  { %242 = vset.pattern.permute.xlu2 %v273_v17 }
  0x18   :  { %165 = vperm.xlu2 %242, %v22_v9  }
  0x1c   :  { %244 = vset.pattern.permute.xlu0 %v273_v17 }
  0x1d   :  { %177 = vperm.xlu0 %244, %v25_v4  }
  0x1e   :  { %243 = vset.pattern.permute.xlu1 %v273_v17 }
  0x1f   :  { %169 = vperm.xlu1 %243, %v23_v5   ;;  %v199_v5 = vstv %s361_s4 }
  0x20   :  { %173 = vperm.xlu2 %242, %v24_v7  }
  0x61   :  { %v104_v33 = vpop.permute.xlu2 %103 }
  0x69   :  { %v108_v34 = vpop.permute.xlu2 %107 }
  0x72   :  { %v166_v38 = vpop.permute.xlu2 %165 }
  0x75   :  { %v50_v12 = vpop.permute.xlu0 %49 }
  0x77   :  { %v40_v15 = vpop.permute.xlu1 %39 }
  0x7a   :  { %v174_v50 = vpop.permute.xlu2 %173 }
  0x7d   :  { %v45_v16 = vpop.permute.xlu0 %44 }
  0x7f   :  { %v35_v22 = vpop.permute.xlu1 %34 }
  0x84   :  { %v82_v21 = vpop.f32.mrf.mxu0 }
  0x85   :  { %v83_v26 = vadd.f32 %v82_v21, %v35_v22 }
  0x86   :  { %v112_v39 = vpop.permute.xlu0 %111 }
  0x87   :  { %v94_v28 = vmax.f32 %v83_v26, 0.0 }
  0x88   :  { %v85_v11 = vpop.f32.mrf.mxu3  ;;  %v116_v36 = vpop.permute.xlu1 %115 }
  0x89   :  { %v86_v23 = vadd.f32 %v85_v11, %v40_v15 }
  0x8b   :  { %v95_v27 = vmax.f32 %v86_v23, 0.0 }
  0x8f   :  { %v178_v57 = vpop.permute.xlu0 %177 }
  0x90   :  { %v88_v14 = vpop.f32.mrf.mxu3 }
  0x91   :  { %v89_v19 = vadd.f32 %v88_v14, %v45_v16  ;;  %v170_v45 = vpop.permute.xlu1 %169 }
  0x93   :  { %v96_v25 = vmax.f32 %v89_v19, 0.0 }
  0x98   :  { %v91_v18 = vpop.f32.mrf.mxu3 }
  0x99   :  { %v92_v20 = vadd.f32 %v91_v18, %v50_v12 }
  0x9b   :  { %v97_v24 = vmax.f32 %v92_v20, 0.0 }
  0x9d   :  { %143 = vmatpush.msra.mxu1 %v97_v24  ;;  %229 = vmatpush.msra.mxu2 %v97_v24 }
  0x9f   :  { %144 = vmatpush.msra.mxu1 %v96_v25  ;;  %230 = vmatpush.msra.mxu2 %v96_v25 }
  0xa1   :  { %145 = vmatpush.msra.mxu1 %v95_v27  ;;  %231 = vmatpush.msra.mxu2 %v95_v27 }
  0xa3   :  { %146 = vmatpush.msra.mxu1 %v94_v28  ;;  %232 = vmatpush.msra.mxu2 %v94_v28 }
  0xa4   :  { %223 = vmatmul.msk.f32.vlgmr.msra.gmra.mxu1 %vm118_vm1, %v98_v29  ;;  %225 = vmatmul.msk.f32.vlgmr.msra.gmra.mxu2 %vm118_vm1, %v100_v30 }
  0xac   :  { %224 = vmatmul.msk.f32.gmra.mxu1 %vm118_vm1, %v99_v31  ;;  %226 = vmatmul.msk.f32.gmra.mxu2 %vm118_vm1, %v101_v32 }
 0x121   :  { %v148_v35 = vpop.f32.mrf.mxu1 }
 0x122   :  { %v149_v37 = vadd.f32 %v148_v35, %v104_v33 }
 0x124   :  { %v160_v41 = vmax.f32 %v149_v37, 0.0 }
 0x126   :  { %v180_v46 = vmul.f32 %v166_v38, %v160_v41 }
 0x127   :  { %v154_v40 = vpop.f32.mrf.mxu2 }
 0x128   :  { %v155_v42 = vadd.f32 %v154_v40, %v112_v39  ;;  %v185_v53 = vsel %vm184_vm2, %v180_v46, 0.0 }
 0x129   :  { %v151_v43 = vpop.f32.mrf.mxu1 }
 0x12a   :  { %v152_v44 = vadd.f32 %v151_v43, %v108_v34  ;;  %v162_v47 = vmax.f32 %v155_v42, 0.0 }
 0x12c   :  { %v161_v48 = vmax.f32 %v152_v44, 0.0  ;;  %v182_v52 = vmul.f32 %v174_v50, %v162_v47 }
 0x12e   :  { %v181_v49 = vmul.f32 %v170_v45, %v161_v48  ;;  %v188_v59 = vsel %vm184_vm2, %v182_v52, 0.0 }
 0x12f   :  { %v157_v51 = vpop.f32.mrf.mxu2 }
 0x130   :  { %v186_v54 = vsel %vm184_vm2, %v181_v49, 0.0  ;;  %v158_v55 = vadd.f32 %v157_v51, %v116_v36 }
 0x131   :  { %v187_v56 = vadd.f32 %v186_v54, %v185_v53 }
 0x132   :  { %v163_v58 = vmax.f32 %v158_v55, 0.0 }
 0x133   :  { %v189_v61 = vadd.f32 %v188_v59, %v187_v56 }
 0x134   :  { %v183_v60 = vmul.f32 %v178_v57, %v163_v58 }
 0x136   :  { %v190_v62 = vsel %vm184_vm2, %v183_v60, 0.0 }
 0x137   :  { %v191_v63 = vadd.f32 %v190_v62, %v189_v61 }
 0x139   :  { %v192_v0 = vrot.slane %v191_v63, 4 }
 0x13b   :  { %v193_v1 = vadd.f32 %v192_v0, %v191_v63 }
 0x13d   :  { %v194_v2 = vrot.slane %v193_v1, 2 }
 0x13f   :  { %v195_v3 = vadd.f32 %v194_v2, %v193_v1 }
 0x141   :  { %v196_v4 = vrot.slane %v195_v3, 1 }
 0x143   :  { %v197_v6 = vadd.f32 %v196_v4, %v195_v3 }
 0x145   :  { %v200_v7 = vadd.f32 %v199_v5, %v197_v6 }
 0x147   :  { %202 = vst.msk [vmem:[#allocation3] sm:$0x1] %vm201_vm3, %v200_v7 }
 0x148   :  { %213 = dma.vmem_to_hbm [thread:$0]  %s209_s20, 16, %s211_s23, [#allocation4]  }
 0x149   :  { %269 = dma.done.wait [#allocation4], 16  }
 0x14a   :  { %270 = vsyncadd [#allocation4], 4294967280 }
 0x14b   :  { %218 = vsyncpa [#allocation4], 1 }

</bundles_post_ra>
